<compile_context>
chip_gen: v5e
topology: v5e:2x2
jax: 0.10.0
libtpu: 0.0.40
codegen_flags: <defaults>
</compile_context>

<pallas_src>
import functools

import jax
import jax.numpy as jnp
from jax import lax
from jax.experimental import pallas as pl
from jax.experimental.pallas import tpu as pltpu


def _round_up(x, m):
    return (x + m - 1) // m * m


def _stable_softplus(x):
    # log(1 + exp(x)) without overflow; single transcendental pass.
    return jnp.maximum(x, 0.0) + jnp.log1p(jnp.exp(-jnp.abs(x)))


# --------------------------------------------------------------------------- #
# Fused kernel: triplt_loss (class-tiled online logsumexp) + global_align_loss
#               (+ optional fine-grained pairwise loss on supplied sims).
# --------------------------------------------------------------------------- #
def _fused_loss_kernel(*refs, epsilon, alpha, beta, scale_pos, scale_neg,
                       align_weight, b_true, b_pad, c_true, c_pad, class_tile,
                       use_bf16, has_fine):
    # refs layout: emb, proj_tile, inv_norm_tile, lbl_col, lbl_row, [sims],
    #              out, m, l, sum, lblv, [emb_bf16 scratch]
    emb_ref, proj_ref, inv_norm_ref, lbl_col_ref, lbl_row_ref = refs[:5]
    i = 5
    sims_ref = None
    if has_fine:
        sims_ref = refs[i]
        i += 1
    out_ref = refs[i]
    i += 1
    m_ref, l_ref, sum_ref, lblv_ref = refs[i:i + 4]
    i += 4
    embc_ref = refs[i] if use_bf16 else None

    c = pl.program_id(0)
    last = pl.num_programs(0) - 1

    # ---- init accumulators / hoisted bf16 cast on the first class tile ------
    @pl.when(c == 0)
    def _init():
        m_ref[...] = jnp.full(m_ref.shape, -1e30, dtype=jnp.float32)
        l_ref[...] = jnp.zeros_like(l_ref)
        sum_ref[...] = jnp.zeros_like(sum_ref)
        lblv_ref[...] = jnp.zeros_like(lblv_ref)
        if use_bf16:
            embc_ref[...] = emb_ref[...].astype(jnp.bfloat16)

    # ---- per-tile: project (bf16 MXU, f32 acc), post-matmul col-norm scale --
    lhs = embc_ref[...] if use_bf16 else emb_ref[...]
    logits = jnp.dot(lhs, proj_ref[...], preferred_element_type=jnp.float32)
    logits = logits * inv_norm_ref[...]            # (2*b_pad, tc) * (1, tc)

    cid = c * class_tile + lax.broadcasted_iota(jnp.int32, logits.shape, 1)
    # label-logit gather (needed on every tile; labels never hit padded classes)
    lblv_ref[...] += jnp.sum(jnp.where(cid == lbl_col_ref[...], logits, 0.0),
                             axis=1, keepdims=True)

    def _accumulate(mask_padded_classes):
        if mask_padded_classes:
            valid = cid < c_true
            lmax_src = jnp.where(valid, logits, -1e30)
            lsum_src = jnp.where(valid, logits, 0.0)
        else:
            lmax_src = logits
            lsum_src = logits
        m_prev = m_ref[...]
        m_new = jnp.maximum(m_prev, jnp.max(lmax_src, axis=1, keepdims=True))
        l_ref[...] = (jnp.exp(m_prev - m_new) * l_ref[...]
                      + jnp.sum(jnp.exp(lmax_src - m_new), axis=1, keepdims=True))
        m_ref[...] = m_new
        sum_ref[...] += jnp.sum(lsum_src, axis=1, keepdims=True)

    if c_pad != c_true:
        # Only the last tile contains padded classes -> mask only there.
        @pl.when(c == last)
        def _masked():
            _accumulate(True)

        @pl.when(c != last)
        def _unmasked():
            _accumulate(False)
    else:
        _accumulate(False)

    # ---- finalize on the last class tile ------------------------------------
    @pl.when(c == last)
    def _finalize():
        # Label-smoothed CE without one-hot:
        #   ce = lse - (1-eps)*logit[y] - (eps/C)*sum_c logit_c
        lse = m_ref[...] + jnp.log(l_ref[...])
        ce = lse - (1.0 - epsilon) * lblv_ref[...] - (epsilon / c_true) * sum_ref[...]
        rid = lax.broadcasted_iota(jnp.int32, ce.shape, 0)
        row_ok = (rid < b_true) | ((rid >= b_pad) & (rid < b_pad + b_true))
        triplt = jnp.sum(jnp.where(row_ok, ce, 0.0)) / b_true

        # Global align loss (cosine sims + single stable softplus), *1.5 folded in.
        v = emb_ref[0:b_pad, :]
        t = emb_ref[b_pad:2 * b_pad, :]
        vn = v * lax.rsqrt(jnp.sum(v * v, axis=1, keepdims=True) + 1e-12)
        tn = t * lax.rsqrt(jnp.sum(t * t, axis=1, keepdims=True) + 1e-12)
        sim = lax.dot_general(vn, tn, (((1,), (1,)), ((), ())),
                              preferred_element_type=jnp.float32)   # (b_pad, b_pad)
        same = lbl_col_ref[0:b_pad, :] == lbl_row_ref[...]
        arg = jnp.where(same, -scale_pos * (sim - alpha), scale_neg * (sim - beta))
        sp = _stable_softplus(arg)
        ri = lax.broadcasted_iota(jnp.int32, sim.shape, 0)
        ci = lax.broadcasted_iota(jnp.int32, sim.shape, 1)
        pair_ok = (ri < b_true) & (ci < b_true)
        align = jnp.sum(jnp.where(pair_ok, sp, 0.0)) * (2.0 * align_weight / b_true)

        lane = lax.broadcasted_iota(jnp.int32, (1, 128), 1)
        res = jnp.where(lane == 0, triplt, jnp.where(lane == 1, align, 0.0))

        if has_fine:
            # 0.5 * (sum0*2/B + sum1*2/B) == (sum0 + sum1) / B
            sims = sims_ref[...]                                    # (2*b_pad, b_pad)
            same2 = lbl_col_ref[...] == lbl_row_ref[...]
            arg2 = jnp.where(same2, -scale_pos * (sims - alpha),
                             scale_neg * (sims - beta))
            sp2 = _stable_softplus(arg2)
            r2 = lax.broadcasted_iota(jnp.int32, sims.shape, 0)
            c2 = lax.broadcasted_iota(jnp.int32, sims.shape, 1)
            ok2 = ((r2 < b_true) | ((r2 >= b_pad) & (r2 < b_pad + b_true))) & (c2 < b_true)
            fine_val = jnp.sum(jnp.where(ok2, sp2, 0.0)) / b_true
            res = jnp.where(lane == 2, fine_val, res)

        out_ref[...] = res


# --------------------------------------------------------------------------- #
# Module wrapper
# --------------------------------------------------------------------------- #
class LossComputation:
    def __init__(self, feature_size, num_classes, epsilon=0.1, key=None,
                 class_tile=1024, use_bf16_matmul=True):
        if key is None:
            key = jax.random.PRNGKey(0)
        k1, k2 = jax.random.split(key)
        self.feature_size = int(feature_size)
        self.num_classes = int(num_classes)
        self.epsilon = float(epsilon)
        self.scale_pos = 10.0
        self.scale_neg = 40.0
        self.use_bf16 = bool(use_bf16_matmul)

        # Static tiling (independent of the batch): pad D to lanes, class dim to tiles.
        self.d_pad = _round_up(self.feature_size, 128)
        self.tc = min(_round_up(self.num_classes, 128), _round_up(int(class_tile), 128))
        self.c_pad = _round_up(self.num_classes, self.tc)
        self.num_tiles = self.c_pad // self.tc

        # projection: xavier_uniform_(gain=1) on a (D, C) matrix.
        limit = (6.0 / (feature_size + num_classes)) ** 0.5
        self.projection = jax.random.uniform(
            k1, (feature_size, num_classes), jnp.float32, -limit, limit)
        # projection_text: torch.randn (not used in forward, kept for parity).
        self.projection_text = jax.random.normal(
            k2, (feature_size, num_classes), jnp.float32)

        # Pre-pad / pre-cast the projection ONCE (not per forward call).
        self._refresh_projection_buffers()

    def _refresh_projection_buffers(self):
        # TODO(synk): call again after every optimizer update of self.projection.
        store_dtype = jnp.bfloat16 if self.use_bf16 else jnp.float32
        norms = jnp.sqrt(jnp.sum(self.projection * self.projection, axis=0))
        inv = 1.0 / jnp.maximum(norms, 1e-12)
        self._inv_col_norm = jnp.pad(
            inv, (0, self.c_pad - self.num_classes)).astype(jnp.float32)[None, :]
        self._proj_padded = jnp.pad(
            self.projection,
            ((0, self.d_pad - self.feature_size),
             (0, self.c_pad - self.num_classes))).astype(store_dtype)

    def __call__(self, visual_embed, textual_embed, labels, fine=False,
                 text_to_image_sim=None, image_to_text_sim=None,
                 global_cdcr_loss=None):
        # TODO(synk): original forward extracts labels via caption.get_field('id');
        # here labels are passed directly as an int array.
        B, D = visual_embed.shape
        assert D == self.feature_size
        b_pad = _round_up(max(B, 1), 8)
        d_pad = self.d_pad
        tc = self.tc

        v = jnp.pad(visual_embed.astype(jnp.float32), ((0, b_pad - B), (0, d_pad - D)))
        t = jnp.pad(textual_embed.astype(jnp.float32), ((0, b_pad - B), (0, d_pad - D)))
        emb = jnp.concatenate([v, t], axis=0)                        # (2*b_pad, d_pad)

        lbl = jnp.pad(labels.astype(jnp.int32).reshape(-1), (0, b_pad - B),
                      constant_values=-1)
        lbl_col = jnp.concatenate([lbl, lbl])[:, None]               # (2*b_pad, 1)
        lbl_row = lbl[None, :]                                       # (1, b_pad)

        has_fine = bool(fine)
        inputs = [emb, self._proj_padded, self._inv_col_norm, lbl_col, lbl_row]
        in_specs = [
            pl.BlockSpec((2 * b_pad, d_pad), lambda c: (0, 0)),      # resident emb (f32)
            pl.BlockSpec((d_pad, tc), lambda c: (0, c)),             # pipelined proj tile
            pl.BlockSpec((1, tc), lambda c: (0, c)),                 # pipelined inv norms
            pl.BlockSpec((2 * b_pad, 1), lambda c: (0, 0)),
            pl.BlockSpec((1, b_pad), lambda c: (0, 0)),
        ]
        if has_fine:
            assert text_to_image_sim is not None and image_to_text_sim is not None, \
                "local needs sim!"
            s1 = jnp.pad(text_to_image_sim.astype(jnp.float32),
                         ((0, b_pad - B), (0, b_pad - B)))
            s2 = jnp.pad(image_to_text_sim.astype(jnp.float32),
                         ((0, b_pad - B), (0, b_pad - B)))
            sims = jnp.concatenate([s1, s2], axis=0)                 # (2*b_pad, b_pad)
            inputs.append(sims)
            in_specs.append(pl.BlockSpec((2 * b_pad, b_pad), lambda c: (0, 0)))

        scratch = [pltpu.VMEM((2 * b_pad, 1), jnp.float32)] * 4
        if self.use_bf16:
            scratch = scratch + [pltpu.VMEM((2 * b_pad, d_pad), jnp.bfloat16)]

        # Explicit VMEM budget (double-buffered streams + resident blocks + scratch),
        # capped at 64 MiB so a v6e-tuned tile can never overflow v7x's VMEM.
        proj_bytes = 2 if self.use_bf16 else 4
        est = (2 * (2 * b_pad * d_pad * 4)                 # emb (double-buffered)
               + 2 * (d_pad * tc * proj_bytes)             # proj tiles
               + 2 * (128 * max(tc, 128) * 4)              # inv-norm tiles (sublane pad)
               + (2 * b_pad * d_pad * 2 if self.use_bf16 else 0)
               + (2 * (2 * b_pad * b_pad * 4) if has_fine else 0)
               + 4 * (2 * b_pad * 128 * 4)                 # scalar-per-row scratch (lane pad)
               + 2 * 128 * 4)
        vmem_limit = int(min(max(est + (4 << 20), 16 << 20), 64 << 20))

        kernel = functools.partial(
            _fused_loss_kernel,
            epsilon=self.epsilon, alpha=0.6, beta=0.4,
            scale_pos=self.scale_pos, scale_neg=self.scale_neg,
            align_weight=1.5, b_true=B, b_pad=b_pad,
            c_true=self.num_classes, c_pad=self.c_pad, class_tile=tc,
            use_bf16=self.use_bf16, has_fine=has_fine,
        )

        out = pl.pallas_call(
            kernel,
            out_shape=jax.ShapeDtypeStruct((1, 128), jnp.float32),
            grid_spec=pltpu.PrefetchScalarGridSpec(
                num_scalar_prefetch=0,
                grid=(self.num_tiles,),
                in_specs=in_specs,
                out_specs=pl.BlockSpec((1, 128), lambda c: (0, 0)),
                scratch_shapes=scratch,
            ),
            compiler_params=pltpu.CompilerParams(
                # Class-tile axis is a reduction -> "arbitrary".
                dimension_semantics=("arbitrary",),
                vmem_limit_bytes=vmem_limit,
            ),
        )(*inputs)

        loss = {
            "triplt_loss": out[0, 0],
            "global_align_loss": out[0, 1],        # *1.5 already folded into the kernel
        }
        if has_fine:
            loss["global_align_local_loss"] = out[0, 2]   # 0.5 folded in
            if global_cdcr_loss is not None:
                loss["global_cdcr_loss"] = global_cdcr_loss
        return loss


# --------------------------------------------------------------------------- #
# Pure-JAX reference (for the correctness check only)
# --------------------------------------------------------------------------- #
def _reference_losses(projection, visual, textual, labels, t2i, i2t, *,
                      epsilon, scale_pos=10.0, scale_neg=40.0, alpha=0.6, beta=0.4):
    labels = labels.astype(jnp.int32)
    B = visual.shape[0]
    C = projection.shape[1]
    pn = projection / jnp.maximum(
        jnp.sqrt(jnp.sum(projection * projection, axis=0, keepdims=True)), 1e-12)
    onehot = jax.nn.one_hot(labels, C, dtype=jnp.float32)
    tgt = (1.0 - epsilon) * onehot + epsilon / C

    def smooth_ce(e):
        logp = jax.nn.log_softmax(e @ pn, axis=1)
        return jnp.sum(-tgt * logp) / B

    def align_from_sim(sim):
        same = labels[:, None] == labels[None, :]
        lp = jnp.log1p(jnp.exp(-scale_pos * (sim - alpha)))
        ln = jnp.log1p(jnp.exp(scale_neg * (sim - beta)))
        return jnp.sum(jnp.where(same, lp, ln)) * 2.0 / B

    vn = visual / jnp.maximum(jnp.linalg.norm(visual, axis=1, keepdims=True), 1e-12)
    tn = textual / jnp.maximum(jnp.linalg.norm(textual, axis=1, keepdims=True), 1e-12)
    return {
        "triplt_loss": smooth_ce(visual) + smooth_ce(textual),
        "global_align_loss": align_from_sim(vn @ tn.T) * 1.5,
        "global_align_local_loss": 0.5 * (align_from_sim(t2i) + align_from_sim(i2t)),
    }


# --------------------------------------------------------------------------- #
if __name__ == "__main__":
    B, D, C = 6, 32, 200  # batch, FEATURE_SIZE, NUM_CLASSES (small demo shapes)

    key = jax.random.PRNGKey(0)
    k_v, k_t, k_p, k_s1, k_s2 = jax.random.split(key, 5)
    visual_embed = jax.random.normal(k_v, (B, D), jnp.float32)
    textual_embed = jax.random.normal(k_t, (B, D), jnp.float32)
    # repeated ids (positive pairs) + an id >= 128 to exercise the 2nd class tile
    labels = jnp.array([0, 1, 0, 2, 150, 150], dtype=jnp.int32)
    t2i = 0.5 * jax.random.normal(k_s1, (B, B), jnp.float32)
    i2t = 0.5 * jax.random.normal(k_s2, (B, B), jnp.float32)

    # class_tile=128 -> 2 class tiles: exercises the online-logsumexp grid, the
    # unmasked interior-tile fast path AND the masked last tile.
    head = LossComputation(feature_size=D, num_classes=C, epsilon=0.1, key=k_p,
                           class_tile=128)
    out = head(visual_embed, textual_embed, labels, fine=True,
               text_to_image_sim=t2i, image_to_text_sim=i2t)
    out = jax.tree_util.tree_map(jax.block_until_ready, out)

    ref = _reference_losses(head.projection, visual_embed, textual_embed, labels,
                            t2i, i2t, epsilon=0.1)
    assert jnp.allclose(out["triplt_loss"], ref["triplt_loss"],
                        rtol=5e-2, atol=5e-2), (out["triplt_loss"], ref["triplt_loss"])
    assert jnp.allclose(out["global_align_loss"], ref["global_align_loss"],
                        rtol=1e-2, atol=1e-2), \
        (out["global_align_loss"], ref["global_align_loss"])
    assert jnp.allclose(out["global_align_local_loss"], ref["global_align_local_loss"],
                        rtol=1e-2, atol=1e-2), \
        (out["global_align_local_loss"], ref["global_align_local_loss"])
    assert all(bool(jnp.isfinite(v)) for v in out.values())
    print("KERNEL_OK")
</pallas_src>

<mosaic_0001>
module attributes {stable_mosaic.version = 11 : i64} {
  func.func @_fused_loss_kernel(%arg0: i32, %arg1: memref<16x128xf32, #tpu.memory_space<vmem>>, %arg2: memref<128x128xbf16, #tpu.memory_space<vmem>>, %arg3: memref<1x128xf32, #tpu.memory_space<vmem>>, %arg4: memref<16x1xi32, #tpu.memory_space<vmem>>, %arg5: memref<1x8xi32, #tpu.memory_space<vmem>>, %arg6: memref<16x8xf32, #tpu.memory_space<vmem>>, %arg7: memref<1x128xf32, #tpu.memory_space<vmem>>, %arg8: memref<16x1xf32, #tpu.memory_space<vmem>>, %arg9: memref<16x1xf32, #tpu.memory_space<vmem>>, %arg10: memref<16x1xf32, #tpu.memory_space<vmem>>, %arg11: memref<16x1xf32, #tpu.memory_space<vmem>>, %arg12: memref<16x128xbf16, #tpu.memory_space<vmem>>) attributes {dimension_semantics = [#tpu.dimension_semantics<arbitrary>], iteration_bounds = array<i64: 2>, scalar_prefetch = 0 : i64, scratch_operands = 5 : i64, tpu.core_type = #tpu.core_type<tc>, window_params = [{pipeline_mode = #tpu.pipeline_mode<synchronous>, transform_indices = @transform_0, window_bounds = array<i64: 16, 128>}, {transform_indices = @transform_1, window_bounds = array<i64: 128, 128>}, {transform_indices = @transform_2, window_bounds = array<i64: 1, 128>}, {pipeline_mode = #tpu.pipeline_mode<synchronous>, transform_indices = @transform_3, window_bounds = array<i64: 16, 1>}, {pipeline_mode = #tpu.pipeline_mode<synchronous>, transform_indices = @transform_4, window_bounds = array<i64: 1, 8>}, {pipeline_mode = #tpu.pipeline_mode<synchronous>, transform_indices = @transform_5, window_bounds = array<i64: 16, 8>}, {pipeline_mode = #tpu.pipeline_mode<synchronous>, transform_indices = @transform_6, window_bounds = array<i64: 1, 128>}]} {
    %c0_i32 = arith.constant 0 : i32
    %0 = arith.cmpi eq, %arg0, %c0_i32 : i32
    %1 = arith.extui %0 : i1 to i32
    %c0_i32_0 = arith.constant 0 : i32
    %2 = arith.cmpi ne, %1, %c0_i32_0 : i32
    scf.if %2 {
      %cst_19 = arith.constant -1.000000e+30 : f32
      %32 = vector.broadcast %cst_19 : f32 to vector<16x1xf32>
      %c0_20 = arith.constant 0 : index
      %c0_21 = arith.constant 0 : index
      %33 = vector.load %arg8[%c0_20, %c0_21] : memref<16x1xf32, #tpu.memory_space<vmem>>, vector<16x1xf32>
      tpu.vector_store %arg8[%c0_20, %c0_21], %32 {strides = array<i32>} : memref<16x1xf32, #tpu.memory_space<vmem>>, vector<16x1xf32>,
      %cst_22 = arith.constant 0.000000e+00 : f32
      %34 = vector.broadcast %cst_22 : f32 to vector<16x1xf32>
      %c0_23 = arith.constant 0 : index
      %c0_24 = arith.constant 0 : index
      %35 = vector.load %arg9[%c0_23, %c0_24] : memref<16x1xf32, #tpu.memory_space<vmem>>, vector<16x1xf32>
      tpu.vector_store %arg9[%c0_23, %c0_24], %34 {strides = array<i32>} : memref<16x1xf32, #tpu.memory_space<vmem>>, vector<16x1xf32>,
      %cst_25 = arith.constant 0.000000e+00 : f32
      %36 = vector.broadcast %cst_25 : f32 to vector<16x1xf32>
      %c0_26 = arith.constant 0 : index
      %c0_27 = arith.constant 0 : index
      %37 = vector.load %arg10[%c0_26, %c0_27] : memref<16x1xf32, #tpu.memory_space<vmem>>, vector<16x1xf32>
      tpu.vector_store %arg10[%c0_26, %c0_27], %36 {strides = array<i32>} : memref<16x1xf32, #tpu.memory_space<vmem>>, vector<16x1xf32>,
      %cst_28 = arith.constant 0.000000e+00 : f32
      %38 = vector.broadcast %cst_28 : f32 to vector<16x1xf32>
      %c0_29 = arith.constant 0 : index
      %c0_30 = arith.constant 0 : index
      %39 = vector.load %arg11[%c0_29, %c0_30] : memref<16x1xf32, #tpu.memory_space<vmem>>, vector<16x1xf32>
      tpu.vector_store %arg11[%c0_29, %c0_30], %38 {strides = array<i32>} : memref<16x1xf32, #tpu.memory_space<vmem>>, vector<16x1xf32>,
      %c0_31 = arith.constant 0 : index
      %c0_32 = arith.constant 0 : index
      %40 = vector.load %arg1[%c0_31, %c0_32] : memref<16x128xf32, #tpu.memory_space<vmem>>, vector<16x128xf32>
      %41 = arith.truncf %40 : vector<16x128xf32> to vector<16x128xbf16>
      %c0_33 = arith.constant 0 : index
      %c0_34 = arith.constant 0 : index
      %42 = vector.load %arg12[%c0_33, %c0_34] : memref<16x128xbf16, #tpu.memory_space<vmem>>, vector<16x128xbf16>
      tpu.vector_store %arg12[%c0_33, %c0_34], %41 {strides = array<i32>} : memref<16x128xbf16, #tpu.memory_space<vmem>>, vector<16x128xbf16>,
    } else {
    }
    %c0 = arith.constant 0 : index
    %c0_1 = arith.constant 0 : index
    %3 = vector.load %arg12[%c0, %c0_1] : memref<16x128xbf16, #tpu.memory_space<vmem>>, vector<16x128xbf16>
    %c0_2 = arith.constant 0 : index
    %c0_3 = arith.constant 0 : index
    %4 = vector.load %arg2[%c0_2, %c0_3] : memref<128x128xbf16, #tpu.memory_space<vmem>>, vector<128x128xbf16>
    %cst = arith.constant dense<0.000000e+00> : vector<16x128xf32>
    %5 = tpu.matmul %3, %4, %cst {dimension_numbers = #tpu.dot_dimension_numbers<[1], [0], [0], [1], [0, 0, 1, 1], [], []>} : vector<16x128xbf16>, vector<128x128xbf16>, vector<16x128xf32> -> vector<16x128xf32>
    %c0_4 = arith.constant 0 : index
    %c0_5 = arith.constant 0 : index
    %6 = vector.load %arg3[%c0_4, %c0_5] : memref<1x128xf32, #tpu.memory_space<vmem>>, vector<1x128xf32>
    %7 = vector.broadcast %6 : vector<1x128xf32> to vector<16x128xf32>
    %8 = arith.mulf %5, %7 : vector<16x128xf32>
    %c128_i32 = arith.constant 128 : i32
    %9 = arith.muli %arg0, %c128_i32 : i32
    %10 = tpu.iota {dimensions = array<i32: 1>} : vector<16x128xi32>
    %11 = vector.broadcast %9 : i32 to vector<16x128xi32>
    %12 = arith.addi %11, %10 : vector<16x128xi32>
    %c0_6 = arith.constant 0 : index
    %c0_7 = arith.constant 0 : index
    %13 = vector.load %arg11[%c0_6, %c0_7] : memref<16x1xf32, #tpu.memory_space<vmem>>, vector<16x1xf32>
    %c0_8 = arith.constant 0 : index
    %c0_9 = arith.constant 0 : index
    %14 = vector.load %arg4[%c0_8, %c0_9] : memref<16x1xi32, #tpu.memory_space<vmem>>, vector<16x1xi32>
    %15 = vector.broadcast %14 : vector<16x1xi32> to vector<16x128xi32>
    %16 = arith.cmpi eq, %12, %15 : vector<16x128xi32>
    %cst_10 = arith.constant 0.000000e+00 : f32
    %17 = vector.broadcast %cst_10 : f32 to vector<16x128xf32>
    %18 = arith.select %16, %8, %17 : vector<16x128xi1>, vector<16x128xf32>
    %cst_11 = arith.constant dense<0.000000e+00> : vector<16xf32>
    %19 = vector.multi_reduction <add>, %18, %cst_11 [1] : vector<16x128xf32> to vector<16xf32>
    %20 = vector.shape_cast %19 : vector<16xf32> to vector<16x1xf32>
    %21 = arith.addf %13, %20 : vector<16x1xf32>
    %c0_12 = arith.constant 0 : index
    %c0_13 = arith.constant 0 : index
    %22 = vector.load %arg11[%c0_12, %c0_13] : memref<16x1xf32, #tpu.memory_space<vmem>>, vector<16x1xf32>
    tpu.vector_store %arg11[%c0_12, %c0_13], %21 {strides = array<i32>} : memref<16x1xf32, #tpu.memory_space<vmem>>, vector<16x1xf32>,
    %c1_i32 = arith.constant 1 : i32
    %23 = arith.cmpi eq, %arg0, %c1_i32 : i32
    %24 = arith.extui %23 : i1 to i32
    %c0_i32_14 = arith.constant 0 : i32
    %25 = arith.cmpi ne, %24, %c0_i32_14 : i32
    scf.if %25 {
      %c200_i32 = arith.constant 200 : i32
      %32 = vector.broadcast %c200_i32 : i32 to vector<16x128xi32>
      %33 = arith.cmpi slt, %12, %32 : vector<16x128xi32>
      %cst_19 = arith.constant -1.000000e+30 : f32
      %34 = vector.broadcast %cst_19 : f32 to vector<16x128xf32>
      %35 = arith.select %33, %8, %34 : vector<16x128xi1>, vector<16x128xf32>
      %cst_20 = arith.constant 0.000000e+00 : f32
      %36 = vector.broadcast %cst_20 : f32 to vector<16x128xf32>
      %37 = arith.select %33, %8, %36 : vector<16x128xi1>, vector<16x128xf32>
      %c0_21 = arith.constant 0 : index
      %c0_22 = arith.constant 0 : index
      %38 = vector.load %arg8[%c0_21, %c0_22] : memref<16x1xf32, #tpu.memory_space<vmem>>, vector<16x1xf32>
      %cst_23 = arith.constant dense<0xFF800000> : vector<16xf32>
      %39 = vector.multi_reduction <maximumf>, %35, %cst_23 [1] : vector<16x128xf32> to vector<16xf32>
      %40 = vector.shape_cast %39 : vector<16xf32> to vector<16x1xf32>
      %41 = arith.maximumf %38, %40 : vector<16x1xf32>
      %42 = arith.subf %38, %41 : vector<16x1xf32>
      %43 = math.exp %42 : vector<16x1xf32>
      %c0_24 = arith.constant 0 : index
      %c0_25 = arith.constant 0 : index
      %44 = vector.load %arg9[%c0_24, %c0_25] : memref<16x1xf32, #tpu.memory_space<vmem>>, vector<16x1xf32>
      %45 = arith.mulf %43, %44 : vector<16x1xf32>
      %46 = vector.broadcast %41 : vector<16x1xf32> to vector<16x128xf32>
      %47 = arith.subf %35, %46 : vector<16x128xf32>
      %48 = math.exp %47 : vector<16x128xf32>
      %cst_26 = arith.constant dense<0.000000e+00> : vector<16xf32>
      %49 = vector.multi_reduction <add>, %48, %cst_26 [1] : vector<16x128xf32> to vector<16xf32>
      %50 = vector.shape_cast %49 : vector<16xf32> to vector<16x1xf32>
      %51 = arith.addf %45, %50 : vector<16x1xf32>
      %c0_27 = arith.constant 0 : index
      %c0_28 = arith.constant 0 : index
      %52 = vector.load %arg9[%c0_27, %c0_28] : memref<16x1xf32, #tpu.memory_space<vmem>>, vector<16x1xf32>
      tpu.vector_store %arg9[%c0_27, %c0_28], %51 {strides = array<i32>} : memref<16x1xf32, #tpu.memory_space<vmem>>, vector<16x1xf32>,
      %c0_29 = arith.constant 0 : index
      %c0_30 = arith.constant 0 : index
      %53 = vector.load %arg8[%c0_29, %c0_30] : memref<16x1xf32, #tpu.memory_space<vmem>>, vector<16x1xf32>
      tpu.vector_store %arg8[%c0_29, %c0_30], %41 {strides = array<i32>} : memref<16x1xf32, #tpu.memory_space<vmem>>, vector<16x1xf32>,
      %c0_31 = arith.constant 0 : index
      %c0_32 = arith.constant 0 : index
      %54 = vector.load %arg10[%c0_31, %c0_32] : memref<16x1xf32, #tpu.memory_space<vmem>>, vector<16x1xf32>
      %cst_33 = arith.constant dense<0.000000e+00> : vector<16xf32>
      %55 = vector.multi_reduction <add>, %37, %cst_33 [1] : vector<16x128xf32> to vector<16xf32>
      %56 = vector.shape_cast %55 : vector<16xf32> to vector<16x1xf32>
      %57 = arith.addf %54, %56 : vector<16x1xf32>
      %c0_34 = arith.constant 0 : index
      %c0_35 = arith.constant 0 : index
      %58 = vector.load %arg10[%c0_34, %c0_35] : memref<16x1xf32, #tpu.memory_space<vmem>>, vector<16x1xf32>
      tpu.vector_store %arg10[%c0_34, %c0_35], %57 {strides = array<i32>} : memref<16x1xf32, #tpu.memory_space<vmem>>, vector<16x1xf32>,
    } else {
    }
    %c1_i32_15 = arith.constant 1 : i32
    %26 = arith.cmpi ne, %arg0, %c1_i32_15 : i32
    %27 = arith.extui %26 : i1 to i32
    %c0_i32_16 = arith.constant 0 : i32
    %28 = arith.cmpi ne, %27, %c0_i32_16 : i32
    scf.if %28 {
      %c0_19 = arith.constant 0 : index
      %c0_20 = arith.constant 0 : index
      %32 = vector.load %arg8[%c0_19, %c0_20] : memref<16x1xf32, #tpu.memory_space<vmem>>, vector<16x1xf32>
      %cst_21 = arith.constant dense<0xFF800000> : vector<16xf32>
      %33 = vector.multi_reduction <maximumf>, %8, %cst_21 [1] : vector<16x128xf32> to vector<16xf32>
      %34 = vector.shape_cast %33 : vector<16xf32> to vector<16x1xf32>
      %35 = arith.maximumf %32, %34 : vector<16x1xf32>
      %36 = arith.subf %32, %35 : vector<16x1xf32>
      %37 = math.exp %36 : vector<16x1xf32>
      %c0_22 = arith.constant 0 : index
      %c0_23 = arith.constant 0 : index
      %38 = vector.load %arg9[%c0_22, %c0_23] : memref<16x1xf32, #tpu.memory_space<vmem>>, vector<16x1xf32>
      %39 = arith.mulf %37, %38 : vector<16x1xf32>
      %40 = vector.broadcast %35 : vector<16x1xf32> to vector<16x128xf32>
      %41 = arith.subf %8, %40 : vector<16x128xf32>
      %42 = math.exp %41 : vector<16x128xf32>
      %cst_24 = arith.constant dense<0.000000e+00> : vector<16xf32>
      %43 = vector.multi_reduction <add>, %42, %cst_24 [1] : vector<16x128xf32> to vector<16xf32>
      %44 = vector.shape_cast %43 : vector<16xf32> to vector<16x1xf32>
      %45 = arith.addf %39, %44 : vector<16x1xf32>
      %c0_25 = arith.constant 0 : index
      %c0_26 = arith.constant 0 : index
      %46 = vector.load %arg9[%c0_25, %c0_26] : memref<16x1xf32, #tpu.memory_space<vmem>>, vector<16x1xf32>
      tpu.vector_store %arg9[%c0_25, %c0_26], %45 {strides = array<i32>} : memref<16x1xf32, #tpu.memory_space<vmem>>, vector<16x1xf32>,
      %c0_27 = arith.constant 0 : index
      %c0_28 = arith.constant 0 : index
      %47 = vector.load %arg8[%c0_27, %c0_28] : memref<16x1xf32, #tpu.memory_space<vmem>>, vector<16x1xf32>
      tpu.vector_store %arg8[%c0_27, %c0_28], %35 {strides = array<i32>} : memref<16x1xf32, #tpu.memory_space<vmem>>, vector<16x1xf32>,
      %c0_29 = arith.constant 0 : index
      %c0_30 = arith.constant 0 : index
      %48 = vector.load %arg10[%c0_29, %c0_30] : memref<16x1xf32, #tpu.memory_space<vmem>>, vector<16x1xf32>
      %cst_31 = arith.constant dense<0.000000e+00> : vector<16xf32>
      %49 = vector.multi_reduction <add>, %8, %cst_31 [1] : vector<16x128xf32> to vector<16xf32>
      %50 = vector.shape_cast %49 : vector<16xf32> to vector<16x1xf32>
      %51 = arith.addf %48, %50 : vector<16x1xf32>
      %c0_32 = arith.constant 0 : index
      %c0_33 = arith.constant 0 : index
      %52 = vector.load %arg10[%c0_32, %c0_33] : memref<16x1xf32, #tpu.memory_space<vmem>>, vector<16x1xf32>
      tpu.vector_store %arg10[%c0_32, %c0_33], %51 {strides = array<i32>} : memref<16x1xf32, #tpu.memory_space<vmem>>, vector<16x1xf32>,
    } else {
    }
    %c1_i32_17 = arith.constant 1 : i32
    %29 = arith.cmpi eq, %arg0, %c1_i32_17 : i32
    %30 = arith.extui %29 : i1 to i32
    %c0_i32_18 = arith.constant 0 : i32
    %31 = arith.cmpi ne, %30, %c0_i32_18 : i32
    scf.if %31 {
      %c0_19 = arith.constant 0 : index
      %c0_20 = arith.constant 0 : index
      %32 = vector.load %arg8[%c0_19, %c0_20] : memref<16x1xf32, #tpu.memory_space<vmem>>, vector<16x1xf32>
      %c0_21 = arith.constant 0 : index
      %c0_22 = arith.constant 0 : index
      %33 = vector.load %arg9[%c0_21, %c0_22] : memref<16x1xf32, #tpu.memory_space<vmem>>, vector<16x1xf32>
      %34 = math.log %33 : vector<16x1xf32>
      %35 = arith.addf %32, %34 : vector<16x1xf32>
      %c0_23 = arith.constant 0 : index
      %c0_24 = arith.constant 0 : index
      %36 = vector.load %arg11[%c0_23, %c0_24] : memref<16x1xf32, #tpu.memory_space<vmem>>, vector<16x1xf32>
      %cst_25 = arith.constant 0.899999976 : f32
      %37 = vector.broadcast %cst_25 : f32 to vector<16x1xf32>
      %38 = arith.mulf %37, %36 : vector<16x1xf32>
      %39 = arith.subf %35, %38 : vector<16x1xf32>
      %c0_26 = arith.constant 0 : index
      %c0_27 = arith.constant 0 : index
      %40 = vector.load %arg10[%c0_26, %c0_27] : memref<16x1xf32, #tpu.memory_space<vmem>>, vector<16x1xf32>
      %cst_28 = arith.constant 5.000000e-04 : f32
      %41 = vector.broadcast %cst_28 : f32 to vector<16x1xf32>
      %42 = arith.mulf %41, %40 : vector<16x1xf32>
      %43 = arith.subf %39, %42 : vector<16x1xf32>
      %44 = tpu.iota {dimensions = array<i32: 0>} : vector<16x1xi32>
      %c6_i32 = arith.constant 6 : i32
      %45 = vector.broadcast %c6_i32 : i32 to vector<16x1xi32>
      %46 = arith.cmpi slt, %44, %45 : vector<16x1xi32>
      %c8_i32 = arith.constant 8 : i32
      %47 = vector.broadcast %c8_i32 : i32 to vector<16x1xi32>
      %48 = arith.cmpi sge, %44, %47 : vector<16x1xi32>
      %c14_i32 = arith.constant 14 : i32
      %49 = vector.broadcast %c14_i32 : i32 to vector<16x1xi32>
      %50 = arith.cmpi slt, %44, %49 : vector<16x1xi32>
      %51 = arith.andi %48, %50 : vector<16x1xi1>
      %52 = arith.ori %46, %51 : vector<16x1xi1>
      %cst_29 = arith.constant 0.000000e+00 : f32
      %53 = vector.broadcast %cst_29 : f32 to vector<16x1xf32>
      %54 = arith.select %52, %43, %53 : vector<16x1xi1>, vector<16x1xf32>
      %55 = vector.shape_cast %54 : vector<16x1xf32> to vector<1x16x1xf32>
      %cst_30 = arith.constant dense<0.000000e+00> : vector<1xf32>
      %56 = vector.multi_reduction <add>, %55, %cst_30 [1, 2] : vector<1x16x1xf32> to vector<1xf32>
      %57 = vector.shape_cast %56 : vector<1xf32> to vector<1x1x1xf32>
      %58 = vector.extract %57[0, 0, 0] : f32 from vector<1x1x1xf32>
      %cst_31 = arith.constant 6.000000e+00 : f32
      %59 = arith.divf %58, %cst_31 : f32
      %c0_32 = arith.constant 0 : index
      %c0_33 = arith.constant 0 : index
      %60 = vector.load %arg1[%c0_32, %c0_33] : memref<16x128xf32, #tpu.memory_space<vmem>>, vector<8x128xf32>
      %c8 = arith.constant 8 : index
      %c0_34 = arith.constant 0 : index
      %61 = vector.load %arg1[%c8, %c0_34] : memref<16x128xf32, #tpu.memory_space<vmem>>, vector<8x128xf32>
      %62 = arith.mulf %60, %60 : vector<8x128xf32>
      %cst_35 = arith.constant dense<0.000000e+00> : vector<8xf32>
      %63 = vector.multi_reduction <add>, %62, %cst_35 [1] : vector<8x128xf32> to vector<8xf32>
      %64 = vector.shape_cast %63 : vector<8xf32> to vector<8x1xf32>
      %cst_36 = arith.constant 9.99999996E-13 : f32
      %65 = vector.broadcast %cst_36 : f32 to vector<8x1xf32>
      %66 = arith.addf %64, %65 : vector<8x1xf32>
      %67 = math.rsqrt %66 : vector<8x1xf32>
      %68 = vector.broadcast %67 : vector<8x1xf32> to vector<8x128xf32>
      %69 = arith.mulf %60, %68 : vector<8x128xf32>
      %70 = arith.mulf %61, %61 : vector<8x128xf32>
      %cst_37 = arith.constant dense<0.000000e+00> : vector<8xf32>
      %71 = vector.multi_reduction <add>, %70, %cst_37 [1] : vector<8x128xf32> to vector<8xf32>
      %72 = vector.shape_cast %71 : vector<8xf32> to vector<8x1xf32>
      %cst_38 = arith.constant 9.99999996E-13 : f32
      %73 = vector.broadcast %cst_38 : f32 to vector<8x1xf32>
      %74 = arith.addf %72, %73 : vector<8x1xf32>
      %75 = math.rsqrt %74 : vector<8x1xf32>
      %76 = vector.broadcast %75 : vector<8x1xf32> to vector<8x128xf32>
      %77 = arith.mulf %61, %76 : vector<8x128xf32>
      %cst_39 = arith.constant dense<0.000000e+00> : vector<8x8xf32>
      %78 = tpu.matmul %69, %77, %cst_39 {dimension_numbers = #tpu.dot_dimension_numbers<[1], [1], [0], [0], [0, 0, 1, 0], [], []>} : vector<8x128xf32>, vector<8x128xf32>, vector<8x8xf32> -> vector<8x8xf32>
      %c0_40 = arith.constant 0 : index
      %c0_41 = arith.constant 0 : index
      %79 = vector.load %arg4[%c0_40, %c0_41] : memref<16x1xi32, #tpu.memory_space<vmem>>, vector<8x1xi32>
      %c0_42 = arith.constant 0 : index
      %c0_43 = arith.constant 0 : index
      %80 = vector.load %arg5[%c0_42, %c0_43] : memref<1x8xi32, #tpu.memory_space<vmem>>, vector<1x8xi32>
      %81 = vector.broadcast %79 : vector<8x1xi32> to vector<8x8xi32>
      %82 = vector.broadcast %80 : vector<1x8xi32> to vector<8x8xi32>
      %83 = arith.cmpi eq, %81, %82 : vector<8x8xi32>
      %cst_44 = arith.constant 6.000000e-01 : f32
      %84 = vector.broadcast %cst_44 : f32 to vector<8x8xf32>
      %85 = arith.subf %78, %84 : vector<8x8xf32>
      %cst_45 = arith.constant -1.000000e+01 : f32
      %86 = vector.broadcast %cst_45 : f32 to vector<8x8xf32>
      %87 = arith.mulf %86, %85 : vector<8x8xf32>
      %cst_46 = arith.constant 4.000000e-01 : f32
      %88 = vector.broadcast %cst_46 : f32 to vector<8x8xf32>
      %89 = arith.subf %78, %88 : vector<8x8xf32>
      %cst_47 = arith.constant 4.000000e+01 : f32
      %90 = vector.broadcast %cst_47 : f32 to vector<8x8xf32>
      %91 = arith.mulf %90, %89 : vector<8x8xf32>
      %92 = arith.select %83, %87, %91 : vector<8x8xi1>, vector<8x8xf32>
      %cst_48 = arith.constant 0.000000e+00 : f32
      %93 = vector.broadcast %cst_48 : f32 to vector<8x8xf32>
      %94 = arith.maximumf %92, %93 : vector<8x8xf32>
      %95 = math.absf %92 : vector<8x8xf32>
      %cst_49 = arith.constant 0.000000e+00 : f32
      %96 = vector.broadcast %cst_49 : f32 to vector<8x8xf32>
      %97 = arith.subf %96, %95 : vector<8x8xf32>
      %98 = math.exp %97 : vector<8x8xf32>
      %99 = math.log1p %98 : vector<8x8xf32>
      %100 = arith.addf %94, %99 : vector<8x8xf32>
      %101 = tpu.iota {dimensions = array<i32: 0>} : vector<8x8xi32>
      %102 = tpu.iota {dimensions = array<i32: 1>} : vector<8x8xi32>
      %c6_i32_50 = arith.constant 6 : i32
      %103 = vector.broadcast %c6_i32_50 : i32 to vector<8x8xi32>
      %104 = arith.cmpi slt, %101, %103 : vector<8x8xi32>
      %c6_i32_51 = arith.constant 6 : i32
      %105 = vector.broadcast %c6_i32_51 : i32 to vector<8x8xi32>
      %106 = arith.cmpi slt, %102, %105 : vector<8x8xi32>
      %107 = arith.andi %104, %106 : vector<8x8xi1>
      %cst_52 = arith.constant 0.000000e+00 : f32
      %108 = vector.broadcast %cst_52 : f32 to vector<8x8xf32>
      %109 = arith.select %107, %100, %108 : vector<8x8xi1>, vector<8x8xf32>
      %110 = vector.shape_cast %109 : vector<8x8xf32> to vector<1x8x8xf32>
      %cst_53 = arith.constant dense<0.000000e+00> : vector<1xf32>
      %111 = vector.multi_reduction <add>, %110, %cst_53 [1, 2] : vector<1x8x8xf32> to vector<1xf32>
      %112 = vector.shape_cast %111 : vector<1xf32> to vector<1x1x1xf32>
      %113 = vector.extract %112[0, 0, 0] : f32 from vector<1x1x1xf32>
      %cst_54 = arith.constant 5.000000e-01 : f32
      %114 = arith.mulf %113, %cst_54 : f32
      %115 = tpu.iota {dimensions = array<i32: 1>} : vector<1x128xi32>
      %c0_i32_55 = arith.constant 0 : i32
      %116 = vector.broadcast %c0_i32_55 : i32 to vector<1x128xi32>
      %117 = arith.cmpi eq, %115, %116 : vector<1x128xi32>
      %c1_i32_56 = arith.constant 1 : i32
      %118 = vector.broadcast %c1_i32_56 : i32 to vector<1x128xi32>
      %119 = arith.cmpi eq, %115, %118 : vector<1x128xi32>
      %cst_57 = arith.constant 0.000000e+00 : f32
      %120 = vector.broadcast %114 : f32 to vector<1x128xf32>
      %121 = vector.broadcast %cst_57 : f32 to vector<1x128xf32>
      %122 = arith.select %119, %120, %121 : vector<1x128xi1>, vector<1x128xf32>
      %123 = vector.broadcast %59 : f32 to vector<1x128xf32>
      %124 = arith.select %117, %123, %122 : vector<1x128xi1>, vector<1x128xf32>
      %c0_58 = arith.constant 0 : index
      %c0_59 = arith.constant 0 : index
      %125 = vector.load %arg6[%c0_58, %c0_59] : memref<16x8xf32, #tpu.memory_space<vmem>>, vector<16x8xf32>
      %c0_60 = arith.constant 0 : index
      %c0_61 = arith.constant 0 : index
      %126 = vector.load %arg4[%c0_60, %c0_61] : memref<16x1xi32, #tpu.memory_space<vmem>>, vector<16x1xi32>
      %c0_62 = arith.constant 0 : index
      %c0_63 = arith.constant 0 : index
      %127 = vector.load %arg5[%c0_62, %c0_63] : memref<1x8xi32, #tpu.memory_space<vmem>>, vector<1x8xi32>
      %128 = vector.broadcast %126 : vector<16x1xi32> to vector<16x8xi32>
      %129 = vector.broadcast %127 : vector<1x8xi32> to vector<16x8xi32>
      %130 = arith.cmpi eq, %128, %129 : vector<16x8xi32>
      %cst_64 = arith.constant 6.000000e-01 : f32
      %131 = vector.broadcast %cst_64 : f32 to vector<16x8xf32>
      %132 = arith.subf %125, %131 : vector<16x8xf32>
      %cst_65 = arith.constant -1.000000e+01 : f32
      %133 = vector.broadcast %cst_65 : f32 to vector<16x8xf32>
      %134 = arith.mulf %133, %132 : vector<16x8xf32>
      %cst_66 = arith.constant 4.000000e-01 : f32
      %135 = vector.broadcast %cst_66 : f32 to vector<16x8xf32>
      %136 = arith.subf %125, %135 : vector<16x8xf32>
      %cst_67 = arith.constant 4.000000e+01 : f32
      %137 = vector.broadcast %cst_67 : f32 to vector<16x8xf32>
      %138 = arith.mulf %137, %136 : vector<16x8xf32>
      %139 = arith.select %130, %134, %138 : vector<16x8xi1>, vector<16x8xf32>
      %cst_68 = arith.constant 0.000000e+00 : f32
      %140 = vector.broadcast %cst_68 : f32 to vector<16x8xf32>
      %141 = arith.maximumf %139, %140 : vector<16x8xf32>
      %142 = math.absf %139 : vector<16x8xf32>
      %cst_69 = arith.constant 0.000000e+00 : f32
      %143 = vector.broadcast %cst_69 : f32 to vector<16x8xf32>
      %144 = arith.subf %143, %142 : vector<16x8xf32>
      %145 = math.exp %144 : vector<16x8xf32>
      %146 = math.log1p %145 : vector<16x8xf32>
      %147 = arith.addf %141, %146 : vector<16x8xf32>
      %148 = tpu.iota {dimensions = array<i32: 0>} : vector<16x8xi32>
      %149 = tpu.iota {dimensions = array<i32: 1>} : vector<16x8xi32>
      %c6_i32_70 = arith.constant 6 : i32
      %150 = vector.broadcast %c6_i32_70 : i32 to vector<16x8xi32>
      %151 = arith.cmpi slt, %148, %150 : vector<16x8xi32>
      %c8_i32_71 = arith.constant 8 : i32
      %152 = vector.broadcast %c8_i32_71 : i32 to vector<16x8xi32>
      %153 = arith.cmpi sge, %148, %152 : vector<16x8xi32>
      %c14_i32_72 = arith.constant 14 : i32
      %154 = vector.broadcast %c14_i32_72 : i32 to vector<16x8xi32>
      %155 = arith.cmpi slt, %148, %154 : vector<16x8xi32>
      %156 = arith.andi %153, %155 : vector<16x8xi1>
      %157 = arith.ori %151, %156 : vector<16x8xi1>
      %c6_i32_73 = arith.constant 6 : i32
      %158 = vector.broadcast %c6_i32_73 : i32 to vector<16x8xi32>
      %159 = arith.cmpi slt, %149, %158 : vector<16x8xi32>
      %160 = arith.andi %157, %159 : vector<16x8xi1>
      %cst_74 = arith.constant 0.000000e+00 : f32
      %161 = vector.broadcast %cst_74 : f32 to vector<16x8xf32>
      %162 = arith.select %160, %147, %161 : vector<16x8xi1>, vector<16x8xf32>
      %163 = vector.shape_cast %162 : vector<16x8xf32> to vector<1x16x8xf32>
      %cst_75 = arith.constant dense<0.000000e+00> : vector<1xf32>
      %164 = vector.multi_reduction <add>, %163, %cst_75 [1, 2] : vector<1x16x8xf32> to vector<1xf32>
      %165 = vector.shape_cast %164 : vector<1xf32> to vector<1x1x1xf32>
      %166 = vector.extract %165[0, 0, 0] : f32 from vector<1x1x1xf32>
      %cst_76 = arith.constant 6.000000e+00 : f32
      %167 = arith.divf %166, %cst_76 : f32
      %c2_i32 = arith.constant 2 : i32
      %168 = vector.broadcast %c2_i32 : i32 to vector<1x128xi32>
      %169 = arith.cmpi eq, %115, %168 : vector<1x128xi32>
      %170 = vector.broadcast %167 : f32 to vector<1x128xf32>
      %171 = arith.select %169, %170, %124 : vector<1x128xi1>, vector<1x128xf32>
      %c0_77 = arith.constant 0 : index
      %c0_78 = arith.constant 0 : index
      %172 = vector.load %arg7[%c0_77, %c0_78] : memref<1x128xf32, #tpu.memory_space<vmem>>, vector<1x128xf32>
      tpu.vector_store %arg7[%c0_77, %c0_78], %171 {strides = array<i32>} : memref<1x128xf32, #tpu.memory_space<vmem>>, vector<1x128xf32>,
    } else {
    }
    return
  }
  func.func @transform_0(%arg0: i32) -> (i32, i32) {
    %c0_i32 = arith.constant 0 : i32
    %c0_i32_0 = arith.constant 0 : i32
    %c0_i32_1 = arith.constant 0 : i32
    return %c0_i32, %c0_i32_0 : i32, i32
  }
  func.func @transform_1(%arg0: i32) -> (i32, i32) {
    %c0_i32 = arith.constant 0 : i32
    %c0_i32_0 = arith.constant 0 : i32
    return %c0_i32, %arg0 : i32, i32
  }
  func.func @transform_2(%arg0: i32) -> (i32, i32) {
    %c0_i32 = arith.constant 0 : i32
    %c0_i32_0 = arith.constant 0 : i32
    return %c0_i32, %arg0 : i32, i32
  }
  func.func @transform_3(%arg0: i32) -> (i32, i32) {
    %c0_i32 = arith.constant 0 : i32
    %c0_i32_0 = arith.constant 0 : i32
    %c0_i32_1 = arith.constant 0 : i32
    return %c0_i32, %c0_i32_0 : i32, i32
  }
  func.func @transform_4(%arg0: i32) -> (i32, i32) {
    %c0_i32 = arith.constant 0 : i32
    %c0_i32_0 = arith.constant 0 : i32
    %c0_i32_1 = arith.constant 0 : i32
    return %c0_i32, %c0_i32_0 : i32, i32
  }
  func.func @transform_5(%arg0: i32) -> (i32, i32) {
    %c0_i32 = arith.constant 0 : i32
    %c0_i32_0 = arith.constant 0 : i32
    %c0_i32_1 = arith.constant 0 : i32
    return %c0_i32, %c0_i32_0 : i32, i32
  }
  func.func @transform_6(%arg0: i32) -> (i32, i32) {
    %c0_i32 = arith.constant 0 : i32
    %c0_i32_0 = arith.constant 0 : i32
    %c0_i32_1 = arith.constant 0 : i32
    return %c0_i32, %c0_i32_0 : i32, i32
  }
}

</mosaic_0001>

<bundles_post_ra>
// kernel: tpu_custom_call.1
= control target key start
LH: loop header
LB: loop body
LE: loop exit
PB: predicated region body
PF: predicated region fallthrough
CT: control target
= control target key end

     0   :  { %11 = vsyncpa [#allocation8], 0  ;;  %s1399_s0 = inlined_call_operand.vmem [shape: f32[16,128], index: 0, kind: input, shape index: {}]   ;;  %s1400_s1 = inlined_call_operand.hbm [shape: bf16[128,256], index: 1, kind: input, shape index: {}]   ;;  %s1401_s2 = inlined_call_operand.vmem [shape: f32[1,256], index: 2, kind: input, shape index: {}]   ;;  %s1402_s3 = inlined_call_operand.vmem [shape: s32[16,1], index: 3, kind: input, shape index: {}]   ;;  %s1403_s4 = inlined_call_operand.vmem [shape: s32[1,8], index: 4, kind: input, shape index: {}]   ;;  %s1404_s5 = inlined_call_operand.vmem [shape: f32[16,8], index: 5, kind: input, shape index: {}]   ;;  %s1405_s6 = inlined_call_operand.hbm [shape: f32[1,128], index: 6, kind: output, shape index: {}]  }
   0x1   :  { %13 = vsyncpa [#allocation8 + $0x1], 0 }
   0x2   :  { %14 = vsyncpa [#allocation9], 0  ;;  %s1171_s21 = smov 0   ;;  %s1173_s22 = smov 0  }
   0x3   :  { %s1175_s23 = smov 0   ;;  %s1177_s24 = smov 0  }
   0x4 LB: > { %s1190_s25 = sadd.s32 4294967295, %s1123_s24   ;;  %s1193_s26 = sadd.s32 1, %s1123_s24   ;;  %s1123_s24 = sphi %s1177_s24, %s1414_s24   ;;  %s1119_s23 = sphi %s1175_s23, %s1413_s23   ;;  %s1115_s22 = sphi %s1173_s22, %s1412_s22   ;;  %s1111_s21 = sphi %s1171_s21, %s1411_s21  }
   0x5   : > { %s45_s27 = ssub.s32 %s1123_s24, %s1193_s26  ;;  %s48_s28 = sadd.s32 1, %s1119_s23 }
   0x6   : > { %p46_p0 = scmp.eq.s32.totalorder %s45_s27, 0  ;;  %p55_p1 = scmp.ne.s32.totalorder %s1119_s23, %s1115_s22 }
   0x7   : > { %p56_p2 = scmp.eq.s32.totalorder %s1123_s24, 0  ;;  %p61_p3 = scmp.ne.s32.totalorder %s1115_s22, %s1111_s21 }
   0x8   : > { %s1203_s29 = scalar_select %p46_p0, %s1119_s23, %s48_s28  }
   0x9   : > { %p1205_p4 = por %p56_p2, %p55_p1  ;;  %p62_p5 = scmp.eq.s32.totalorder %s1190_s25, 0 }
   0xa   : > { %p933_p6 = scmp.lt.s32.totalorder %s1123_s24, 2  ;;  %s207_s8 = sand.u32 1, %s1119_s23  }
   0xb   : > { %p1211_p7 = por %p62_p5, %p61_p3  ;;  %s846_s9 = sshll.u32 %s207_s8, 6 }
   0xc   : > { %s847_s10 = sshll.u32 %s1123_s24, 2  ;;  %s211_s14 = scalar_lea.vmem [#allocation7], %s846_s9 }
   0xd   : > { %s215_s13 = scalar_lea.hbm %s1400_s1, %s847_s10  ;;  %s218_s15 = sshll.u32 %s211_s14, 4  ;;  %s219_s15 = int_to_ptr.vmem [resolvable:$true] %s218_s15 }
   0xe   : > { %s216_s16 = sshll.u32 %s215_s13, 4  ;;  %p1222_p8 = pnand %p933_p6, %p1205_p4  ;;  %s217_s16 = int_to_ptr.hbm [resolvable:$true] %s216_s16 }
   0xf   : > { %s208_s18 = scalar_lea.sflag [#allocation8], %s207_s8  ;;  %s1027_s19 = sshra.s32 %s217_s16, 4  ;;  %s1028_s19 = int_to_ptr.hbm [resolvable:$true] %s1027_s19 }
  0x10   : > { %s1029_s20 = scalar_lea.hbm %s1028_s19, 64  ;;  %p1031_p10 = pneg %p1222_p8 }
  0x11   : > { %p1030_p9 = scmp.ne.s32.totalorder %s1028_s19, %s1029_s20  ;;  %s1034_s28 = scalar_lea.hbm %s1400_s1, 128 }
  0x12   : > { %p1035_p13 = scmp.lt.s32.totalorder %s1028_s19, %s1400_s1  ;;  %p1036_p0 = scmp.lt.s32.totalorder %s1034_s28, %s1029_s20 }
  0x13   : > { %p1032_p11 = pnand %p1031_p10, %p1030_p9 }
  0x14   : > { %p1037_p1 = por %p1036_p0, %p1035_p13 }
  0x15   : > { %p1033_p12 = pneg %p1032_p11 }
  0x17   : > { %p1038_p2 = pnand %p1037_p1, %p1033_p12 }
  0x19   : > { %1041 = shalt.err (!%p1038_p2)
}
  0x1a   : > { %s1125_s8 = smov 128   ;;  %s1126_s10 = smov 64  }
  0x1b   : > { %s1127_s11 = smov 4   ;;  %p848_p3 = scmp.ge.s32.totalorder %s1123_s24, 1 }
  0x1c   : > { %932 = dma.hbm_to_vmem [thread:$0]  (!%p1222_p8), %s217_s16, 1024, %s219_s15, %s208_s18, %s1125_s8, %s1126_s10, %s1127_s11  }
  0x1d   : > { %p232_p4 = scmp.lt.s32.totalorder %s1123_s24, 3 }
  0x1f   : > { %p233_p5 = pnand %p848_p3, %p232_p4 }
  0x20   : > { %s238_s12 = sand.u32 (!%p233_p5), 1, %s1115_s22  }
  0x21   : > { %236 = sbr.rel (%p233_p5) target bundleno = 1600 (0x640), region = 44  ;;  %s849_s13 = sshll.u32 (!%p233_p5), %s238_s12, 6 }
  0x22   : > { %s239_s14 = scalar_lea.sflag (!%p233_p5), [#allocation8], %s238_s12  ;;  %s1239_s19 = scalar_lea.vmem (!%p233_p5), [#allocation7], %s849_s13 }
  0x26   : > { %1102 = dma.done.wait (%p1211_p7), %s239_s14, 1024  }
  0x27   : > { %1104 = vsyncadd (%p1211_p7), %s239_s14, 4294966272  ;;  %p270_p6 = scmp.lt.s32.totalorder %s1190_s25, 1  ;;  %p850_p8 = scmp.ne.s32.totalorder %s1190_s25, 0 }
  0x29   : > { %s1247_s15 = scalar_select %p270_p6, %s1190_s25, 1 }
  0x2a   : > { %276 = sbr.rel (%p850_p8) target bundleno = 57 (0x39), region = 52 }
  0x2b   : > { %s272_s17 = scalar_lea.vmem %s1401_s2, %s1247_s15 }
  0x2f   : > { %vm277_vm0 = vcmask 7168   ;;  %v1128_v0 = vmov -1e+30   ;;  %v286_v1 = vld [vmem:[%s1399_s0] sm:$0xff]  ;;  %v287_v2 = vld [vmem:[%s1399_s0 + $0x8] sm:$0xff]  ;;  %v1129_v3 = vmov 0.0  }
  0x30   : > { %278 = vst.msk [vmem:[#allocation2] sm:$0xff] %vm277_vm0, %v1128_v0  ;;  %v913_v4 = vpack.c.bf16 %v287_v2, %v286_v1 }
  0x31   : > { %279 = vst.msk [vmem:[#allocation2 + $0x8] sm:$0xff] %vm277_vm0, %v1128_v0 }
  0x32   : > { %280 = vst.msk [vmem:[#allocation3] sm:$0xff] %vm277_vm0, %v1129_v3 }
  0x33   : > { %281 = vst.msk [vmem:[#allocation3 + $0x8] sm:$0xff] %vm277_vm0, %v1129_v3 }
  0x34   : > { %282 = vst.msk [vmem:[#allocation4] sm:$0xff] %vm277_vm0, %v1129_v3 }
  0x35   : > { %283 = vst.msk [vmem:[#allocation4 + $0x8] sm:$0xff] %vm277_vm0, %v1129_v3 }
  0x36   : > { %284 = vst.msk [vmem:[#allocation5] sm:$0xff] %vm277_vm0, %v1129_v3 }
  0x37   : > { %285 = vst.msk [vmem:[#allocation5 + $0x8] sm:$0xff] %vm277_vm0, %v1129_v3 }
  0x38   : > { %914 = vst [vmem:[#allocation6] sm:$0xff] %v913_v4  }
  0x39 PF: > { %v909_v5 = vld [vmem:[%s1239_s19 + $0x38] sm:$0xff]  ;;  %v908_v6 = vld [vmem:[%s1239_s19 + $0x30] sm:$0xff]  ;;  %v1130_v7 = vmov 0   ;;  %v907_v9 = vld [vmem:[%s1239_s19 + $0x28] sm:$0xff]  ;;  %v385_v17 = vlaneseq  ;;  %s887_s8 = sshll.u32 %s1190_s25, 7  ;;  %vm409_vm3 = vcmask 7168  }
  0x3a   : > { %364 = vmatpush.bf16.msra.mxu0 %v909_v5  ;;  %979 = vset.pattern.permute.xlu0 %v1130_v7  ;;  %v391_v8 = vld [vmem:[%s1402_s3] sm:$0xff]  ;;  %v392_v10 = vld [vmem:[%s1402_s3 + $0x8] sm:$0xff]  ;;  %v904_v13 = vld [vmem:[%s1239_s19 + $0x10] sm:$0xff]  ;;  %v387_v19 = vstv %s887_s8  ;;  %p888_p7 = scmp.ne.s32.totalorder %s1190_s25, 1 }
  0x3b   : > { %394 = vperm.xlu0 %979, %v391_v8   ;;  %v906_v11 = vld [vmem:[%s1239_s19 + $0x20] sm:$0xff]  ;;  %v905_v12 = vld [vmem:[%s1239_s19 + $0x18] sm:$0xff]  ;;  %v903_v14 = vld [vmem:[%s1239_s19 + $0x8] sm:$0xff]  ;;  %v1276_v18 = vand.u32 127, %v385_v17 }
  0x3c   : > { %v902_v15 = vld [vmem:[%s1239_s19] sm:$0xff]  ;;  %v980_v22 = vld [vmem:[%s272_s17] ss:$0 sm:$0xff] }
  0x3d   : > { %v388_v20 = vadd.s32 %v387_v19, %v1276_v18  ;;  %v389_v30 = vld [vmem:[#allocation5] sm:$0xff] }
  0x3e   : > { %365 = vmatpush.bf16.msra.mxu0 %v908_v6  ;;  %v390_v33 = vld [vmem:[#allocation5 + $0x8] sm:$0xff] }
  0x3f   : > { %v901_v16 = vld [vmem:[#allocation6] sm:$0xff] }
  0x42   : > { %366 = vmatpush.bf16.msra.mxu0 %v907_v9 }
  0x43   : > { %397 = vperm.xlu0 %979, %v392_v10  }
  0x46   : > { %367 = vmatpush.bf16.msra.mxu0 %v906_v11 }
  0x4a   : > { %368 = vmatpush.bf16.msra.mxu0 %v905_v12 }
  0x4e   : > { %369 = vmatpush.bf16.msra.mxu0 %v904_v13 }
  0x52   : > { %370 = vmatpush.bf16.msra.mxu0 %v903_v14 }
  0x56   : > { %371 = vmatpush.bf16.msra.mxu0 %v902_v15 }
  0x59   : > { %372 = vmatmul.bf16.vlgmr.msra.gmra.mxu0 %v901_v16 }
  0xad   : > { %v395_v21 = vpop.permute.xlu0 %394 }
  0xae   : > { %vm399_vm1 = vcmp.eq.s32.totalorder %v388_v20, %v395_v21 }
  0xb5   : > { %v398_v26 = vpop.permute.xlu0 %397 }
  0xb6   : > { %vm400_vm2 = vcmp.eq.s32.totalorder %v388_v20, %v398_v26 }
  0xd6   : > { %v373_v23 = vpop.f32.mrf.mxu0 }
  0xd7   : > { %v1284_v24 = vmul.f32 %v980_v22, %v373_v23 }
  0xd9   : > { %v401_v25 = vsel %vm399_vm1, %v1284_v24, 0.0 }
  0xda   : > { %403 = vadd.xlane.f32.xlu1 %v401_v25 }
  0xde   : > { %v375_v27 = vpop.f32.mrf.mxu0 }
  0xdf   : > { %v1287_v28 = vmul.f32 %v980_v22, %v375_v27 }
  0xe1   : > { %v402_v29 = vsel %vm400_vm2, %v1287_v28, 0.0 }
  0xe2   : > { %405 = vadd.xlane.f32.xlu1 %v402_v29 }
 0x14d   : > { %v404_v31 = vpop.xlane.xlu1 %403 }
 0x14e   : > { %v407_v32 = vadd.f32 %v404_v31, %v389_v30 }
 0x150   : > { %410 = vst.msk [vmem:[#allocation5] sm:$0xff] %vm409_vm3, %v407_v32 }
 0x154   : > { %415 = sbr.rel (%p888_p7) target bundleno = 718 (0x2ce), region = 56 }
 0x155   : > { %v406_v34 = vpop.xlane.xlu1 %405 }
 0x156   : > { %v408_v35 = vadd.f32 %v406_v34, %v390_v33 }
 0x158   : > { %411 = vst.msk [vmem:[#allocation5 + $0x8] sm:$0xff] %vm409_vm3, %v408_v35 }
 0x159   : > { %vm416_vm4 = vcmp.lt.s32.totalorder %v388_v20, 200  ;;  %v1131_v38 = vmov 0   ;;  %v421_v39 = vld [vmem:[#allocation2] sm:$0xff]  ;;  %v422_v43 = vld [vmem:[#allocation2 + $0x8] sm:$0xff]  ;;  %v435_v2 = vld [vmem:[#allocation3] sm:$0xff] }
 0x15a   : > { %v417_v36 = vsel %vm416_vm4, %v1284_v24, -1e+30  ;;  %v418_v37 = vsel %vm416_vm4, %v1287_v28, -1e+30  ;;  %981 = vset.pattern.permute.xlu1 %v1131_v38  ;;  %982 = vset.pattern.permute.xlu0 %v1131_v38  ;;  %v419_v47 = vsel %vm416_vm4, %v1284_v24, 0.0  ;;  %v420_v48 = vsel %vm416_vm4, %v1287_v28, 0.0 }
 0x15b   : > { %423 = vmax.xlane.f32.xlu0 %v417_v36  ;;  %v466_v57 = vld [vmem:[#allocation4 + $0x8] sm:$0xff]  ;;  %v465_v59 = vld [vmem:[#allocation4] sm:$0xff]  ;;  %v436_v7 = vld [vmem:[#allocation3 + $0x8] sm:$0xff] }
 0x163   : > { %425 = vmax.xlane.f32.xlu0 %v418_v37 }
 0x16b   : > { %467 = vadd.xlane.f32.xlu0 %v419_v47 }
 0x1ce   : > { %v424_v40 = vpop.xlane.xlu0 %423 }
 0x1cf   : > { %v427_v41 = vmax.f32 %v421_v39, %v424_v40 }
 0x1d1   : > { %v429_v42 = vsub.f32 %v421_v39, %v427_v41  ;;  %463 = vst.msk [vmem:[#allocation2] sm:$0xff] %vm409_vm3, %v427_v41  ;;  %441 = vperm.xlu1 %981, %v427_v41  }
 0x1d3   : > { %v431_v63 = vmul.f32 1.442695, %v429_v42 }
 0x1d6   : > { %v426_v44 = vpop.xlane.xlu0 %425 }
 0x1d7   : > { %v428_v45 = vmax.f32 %v422_v43, %v426_v44 }
 0x1d9   : > { %v430_v46 = vsub.f32 %v422_v43, %v428_v45  ;;  %464 = vst.msk [vmem:[#allocation2 + $0x8] sm:$0xff] %vm409_vm3, %v428_v45  ;;  %446 = vperm.xlu1 %981, %v428_v45  }
 0x1db   : > { %v433_v0 = vmul.f32 1.442695, %v430_v46 }
 0x1de   : > { %v468_v60 = vpop.xlane.xlu0 %467 }
 0x1df   : > { %v471_v62 = vadd.f32 %v468_v60, %v465_v59 }
 0x1e1   : > { %473 = vst.msk [vmem:[#allocation4] sm:$0xff] %vm409_vm3, %v471_v62 }
 0x203   : > { %469 = vadd.xlane.f32.xlu1 %v420_v48 }
 0x243   : > { %v442_v49 = vpop.permute.xlu1 %441 }
 0x244   : > { %v449_v50 = vsub.f32 %v417_v36, %v442_v49 }
 0x246   : > { %v451_v51 = vmul.f32 1.442695, %v449_v50 }
 0x248   : > { %983 = vpow2.f32 %v451_v51 }
 0x24b   : > { %v447_v52 = vpop.permute.xlu1 %446 }
 0x24c   : > { %v450_v53 = vsub.f32 %v418_v37, %v447_v52 }
 0x24e   : > { %v984_v54 = vpop.eup %983  ;;  %v453_v55 = vmul.f32 1.442695, %v450_v53 }
 0x24f   : > { %455 = vadd.xlane.f32.xlu2 %v984_v54 }
 0x250   : > { %985 = vpow2.f32 %v453_v55 }
 0x251   : > { %987 = vpow2.f32 %v431_v63 }
 0x252   : > { %989 = vpow2.f32 %v433_v0 }
 0x256   : > { %v986_v56 = vpop.eup %985 }
 0x257   : > { %457 = vadd.xlane.f32.xlu2 %v986_v56  ;;  %v988_v1 = vpop.eup %987 }
 0x258   : > { %v437_v3 = vmul.f32 %v988_v1, %v435_v2  ;;  %v990_v6 = vpop.eup %989 }
 0x259   : > { %v438_v8 = vmul.f32 %v990_v6, %v436_v7 }
 0x276   : > { %v470_v58 = vpop.xlane.xlu1 %469 }
 0x277   : > { %v472_v61 = vadd.f32 %v470_v58, %v466_v57 }
 0x279   : > { %474 = vst.msk [vmem:[#allocation4 + $0x8] sm:$0xff] %vm409_vm3, %v472_v61 }
 0x2c2   : > { %v456_v4 = vpop.xlane.xlu2 %455 }
 0x2c3   : > { %v459_v5 = vadd.f32 %v456_v4, %v437_v3 }
 0x2c5   : > { %461 = vst.msk [vmem:[#allocation3] sm:$0xff] %vm409_vm3, %v459_v5 }
 0x2ca   : > { %v458_v9 = vpop.xlane.xlu2 %457 }
 0x2cb   : > { %v460_v10 = vadd.f32 %v458_v9, %v438_v8 }
 0x2cd   : > { %462 = vst.msk [vmem:[#allocation3 + $0x8] sm:$0xff] %vm409_vm3, %v460_v10 }
 0x2ce PF: > { %p889_p9 = scmp.eq.s32.totalorder %s1190_s25, 1 }
 0x2d0   : > { %478 = sbr.rel (%p889_p9) target bundleno = 1096 (0x448), region = 60 }
 0x2d5   : > { %481 = vmax.xlane.f32.xlu0 %v1284_v24  ;;  %v1132_v11 = vmov 0   ;;  %v479_v12 = vld [vmem:[#allocation2] sm:$0xff]  ;;  %v480_v16 = vld [vmem:[#allocation2 + $0x8] sm:$0xff]  ;;  %v493_v39 = vld [vmem:[#allocation3] sm:$0xff] }
 0x2d6   : > { %991 = vset.pattern.permute.xlu1 %v1132_v11  ;;  %992 = vset.pattern.permute.xlu0 %v1132_v11  ;;  %v523_v33 = vld [vmem:[#allocation4] sm:$0xff]  ;;  %v524_v35 = vld [vmem:[#allocation4 + $0x8] sm:$0xff]  ;;  %v494_v44 = vld [vmem:[#allocation3 + $0x8] sm:$0xff] }
 0x2dd   : > { %483 = vmax.xlane.f32.xlu0 %v1287_v28 }
 0x2e5   : > { %525 = vadd.xlane.f32.xlu0 %v1284_v24 }
 0x348   : > { %v482_v13 = vpop.xlane.xlu0 %481 }
 0x349   : > { %v485_v14 = vmax.f32 %v479_v12, %v482_v13 }
 0x34b   : > { %v487_v15 = vsub.f32 %v479_v12, %v485_v14  ;;  %521 = vst.msk [vmem:[#allocation2] sm:$0xff] %vm409_vm3, %v485_v14  ;;  %499 = vperm.xlu1 %991, %v485_v14  }
 0x350   : > { %v484_v19 = vpop.xlane.xlu0 %483 }
 0x351   : > { %v486_v20 = vmax.f32 %v480_v16, %v484_v19 }
 0x353   : > { %v488_v21 = vsub.f32 %v480_v16, %v486_v20  ;;  %522 = vst.msk [vmem:[#allocation2 + $0x8] sm:$0xff] %vm409_vm3, %v486_v20  ;;  %504 = vperm.xlu1 %991, %v486_v20  }
 0x355   : > { %v491_v38 = vmul.f32 1.442695, %v488_v21 }
 0x358   : > { %v526_v32 = vpop.xlane.xlu0 %525 }
 0x359   : > { %v529_v34 = vadd.f32 %v526_v32, %v523_v33 }
 0x35b   : > { %531 = vst.msk [vmem:[#allocation4] sm:$0xff] %vm409_vm3, %v529_v34 }
 0x37d   : > { %527 = vadd.xlane.f32.xlu1 %v1287_v28 }
 0x3bd   : > { %v500_v22 = vpop.permute.xlu1 %499 }
 0x3be   : > { %v507_v23 = vsub.f32 %v1284_v24, %v500_v22  ;;  %v489_v24 = vmul.f32 1.442695, %v487_v15 }
 0x3c0   : > { %v509_v25 = vmul.f32 1.442695, %v507_v23 }
 0x3c2   : > { %993 = vpow2.f32 %v509_v25 }
 0x3c5   : > { %v505_v26 = vpop.permute.xlu1 %504 }
 0x3c6   : > { %v508_v27 = vsub.f32 %v1287_v28, %v505_v26 }
 0x3c8   : > { %v994_v29 = vpop.eup %993  ;;  %v511_v30 = vmul.f32 1.442695, %v508_v27 }
 0x3c9   : > { %513 = vadd.xlane.f32.xlu2 %v994_v29 }
 0x3ca   : > { %995 = vpow2.f32 %v511_v30 }
 0x3cb   : > { %997 = vpow2.f32 %v489_v24 }
 0x3cc   : > { %999 = vpow2.f32 %v491_v38 }
 0x3d0   : > { %v996_v31 = vpop.eup %995 }
 0x3d1   : > { %515 = vadd.xlane.f32.xlu2 %v996_v31  ;;  %v998_v28 = vpop.eup %997 }
 0x3d2   : > { %v495_v40 = vmul.f32 %v998_v28, %v493_v39  ;;  %v1000_v43 = vpop.eup %999 }
 0x3d3   : > { %v496_v45 = vmul.f32 %v1000_v43, %v494_v44 }
 0x3f0   : > { %v528_v36 = vpop.xlane.xlu1 %527 }
 0x3f1   : > { %v530_v37 = vadd.f32 %v528_v36, %v524_v35 }
 0x3f3   : > { %532 = vst.msk [vmem:[#allocation4 + $0x8] sm:$0xff] %vm409_vm3, %v530_v37 }
 0x43c   : > { %v514_v41 = vpop.xlane.xlu2 %513 }
 0x43d   : > { %v517_v42 = vadd.f32 %v514_v41, %v495_v40 }
 0x43f   : > { %519 = vst.msk [vmem:[#allocation3] sm:$0xff] %vm409_vm3, %v517_v42 }
 0x444   : > { %v516_v46 = vpop.xlane.xlu2 %515 }
 0x445   : > { %v518_v47 = vadd.f32 %v516_v46, %v496_v45 }
 0x447   : > { %520 = vst.msk [vmem:[#allocation3 + $0x8] sm:$0xff] %vm409_vm3, %v518_v47 }
 0x448 PF: > { %535 = sbr.rel (%p888_p7) target bundleno = 1595 (0x63b), region = 64 }
 0x44d   : > { %v595_v48 = vld [vmem:[%s1399_s0 + $0x8] sm:$0xff]  ;;  %v646_v49 = vld [vmem:[%s1402_s3] sm:$0xff]  ;;  %v1133_v51 = vmov 0   ;;  %v559_v45 = vshrl.u32 %v385_v17, 7  ;;  %vm673_vm1 = vcmp.lt.s32.totalorder %v1276_v18, 6  ;;  %vm676_vm4 = vcmask 64512  }
 0x44e   : > { %v611_v50 = vmul.f32 %v595_v48, %v595_v48  ;;  %1001 = vset.pattern.permute.xlu1 %v1133_v51  ;;  %1002 = vset.pattern.permute.xlu2 %v1133_v51  ;;  %v594_v52 = vld [vmem:[%s1399_s0] sm:$0xff]  ;;  %v697_v54 = vld [vmem:[%s1402_s3 + $0x8] sm:$0xff] }
 0x44f   : > { %649 = vperm.xlu1 %1001, %v646_v49   ;;  %1003 = vset.pattern.permute.xlu0 %v1133_v51  ;;  %v596_v53 = vmul.f32 %v594_v52, %v594_v52  ;;  %v694_v12 = vld [vmem:[%s1404_s5] sm:$0xff]  ;;  %v695_v21 = vld [vmem:[%s1404_s5 + $0x8] sm:$0xff]  ;;  %vm561_vm15 = vcmp.lt.s32.totalorder %v559_v45, 6 }
 0x450   : > { %612 = vadd.xlane.f32.xlu0 %v611_v50  ;;  %702 = vperm.xlu2 %1002, %v697_v54   ;;  %v893_v13 = vadd.f32 -0.6, %v694_v12  ;;  %v895_v14 = vadd.f32 -0.4, %v694_v12  ;;  %v1346_v15 = vld [vmem:[%s1403_s4] ss:$0 sm:$0xff]  ;;  %vm1356_vm2 = vmand %vm561_vm15, %vm673_vm1 }
 0x451   : > { %v894_v23 = vadd.f32 -0.6, %v695_v21  ;;  %v896_v25 = vadd.f32 -0.4, %v695_v21  ;;  %v553_v12 = vld [vmem:[#allocation4 + $0x8] sm:$0xff] }
 0x452   : > { %v708_v19 = vmul.f32 -10.0, %v893_v13  ;;  %v712_v20 = vmul.f32 40.0, %v895_v14  ;;  %v555_v21 = vmul.f32 0.0005, %v553_v12 }
 0x453   : > { %v709_v27 = vmul.f32 -10.0, %v894_v23  ;;  %v713_v29 = vmul.f32 40.0, %v896_v25 }
 0x457   : > { %699 = vperm.xlu1 %1001, %v646_v49  }
 0x458   : > { %597 = vadd.xlane.f32.xlu0 %v596_v53  ;;  %v560_v53 = vadd.s32 8, %v559_v45 }
 0x45a   : > { %vm566_vm0 = vcmp.lt.s32.totalorder %v560_v53, 14 }
 0x4aa   : > { %v703_v31 = vpop.permute.xlu2 %702 }
 0x4ab   : > { %vm705_vm12 = vcmp.eq.s32.totalorder %v703_v31, %v1346_v15 }
 0x4ac   : > { %v715_v32 = vsel %vm705_vm12, %v709_v27, %v713_v29 }
 0x4ad   : > { %v719_v33 = vand.u32 2147483647, %v715_v32  ;;  %v717_v49 = vmax.f32 %v715_v32, 0.0 }
 0x4af   : > { %v721_v35 = vsub.f32 0.0, %v719_v33 }
 0x4b1   : > { %v724_v36 = vmul.f32 1.442695, %v721_v35 }
 0x4c1   : > { %v1338_v11 = vpop.permute.xlu1 %649 }
 0x4c3   : > { %v613_v55 = vpop.xlane.xlu0 %612 }
 0x4c4   : > { %v614_v56 = vadd.f32 1e-12, %v613_v55 }
 0x4c6   : > { %1005 = vrsqrt.f32 %v614_v56  ;;  %vm621_vm6 = vweird.f32 %v614_v56 }
 0x4c9   : > { %v700_v16 = vpop.permute.xlu1 %699 }
 0x4ca   : > { %vm704_vm11 = vcmp.eq.s32.totalorder %v700_v16, %v1346_v15 }
 0x4cb   : > { %v598_v57 = vpop.xlane.xlu0 %597  ;;  %v714_v22 = vsel %vm704_vm11, %v708_v19, %v712_v20 }
 0x4cc   : > { %v1006_v58 = vpop.eup %1005  ;;  %v599_v59 = vadd.f32 1e-12, %v598_v57  ;;  %v718_v26 = vand.u32 2147483647, %v714_v22  ;;  %v716_v44 = vmax.f32 %v714_v22, 0.0 }
 0x4cd   : > { %v616_v60 = vmul.f32 %v1006_v58, %v614_v56  ;;  %vm622_vm5 = vweird.f32 %v1006_v58 }
 0x4ce   : > { %1007 = vrsqrt.f32 %v599_v59  ;;  %vm623_vm7 = vmor %vm621_vm6, %vm622_vm5  ;;  %vm606_vm9 = vweird.f32 %v599_v59  ;;  %v720_v30 = vsub.f32 0.0, %v718_v26  ;;  %vm652_vm6 = vcmp.eq.s32.totalorder %v1338_v11, %v1346_v15 }
 0x4cf   : > { %v617_v61 = vmul.f32 %v1006_v58, %v616_v60  ;;  %vm747_vm5 = vmand %vm566_vm0, %vm673_vm1 }
 0x4d0   : > { %v722_v34 = vmul.f32 1.442695, %v720_v30 }
 0x4d1   : > { %v618_v62 = vmul.f32 0.5, %v617_v61 }
 0x4d2   : > { %1009 = vpow2.f32 %v722_v34 }
 0x4d3   : > { %v619_v63 = vsub.f32 1.5, %v618_v62  ;;  %1011 = vpow2.f32 %v724_v36 }
 0x4d4   : > { %v1008_v0 = vpop.eup %1007 }
 0x4d5   : > { %v601_v1 = vmul.f32 %v1008_v0, %v599_v59  ;;  %v620_v2 = vmul.f32 %v1006_v58, %v619_v63  ;;  %vm607_vm8 = vweird.f32 %v1008_v0 }
 0x4d6   : > { %vm608_vm10 = vmor %vm606_vm9, %vm607_vm8  ;;  %vm689_vm8 = vcmp.eq.s32.totalorder %v1276_v18, 1  ;;  %vm688_vm9 = vcmp.eq.s32.totalorder %v1276_v18, 0 }
 0x4d7   : > { %v602_v3 = vmul.f32 %v1008_v0, %v601_v1  ;;  %v624_v4 = vsel %vm623_vm7, %v1006_v58, %v620_v2  ;;  %v539_v1 = vld [vmem:[#allocation3 + $0x8] sm:$0xff]  ;;  %v546_v2 = vld [vmem:[#allocation5] sm:$0xff] }
 0x4d8   : > { %v625_v5 = vmul.f32 %v624_v4, %v595_v48  ;;  %v1010_v37 = vpop.eup %1009 }
 0x4d9   : > { %v603_v6 = vmul.f32 0.5, %v602_v3  ;;  %v1012_v24 = vpop.eup %1011  ;;  %v726_v38 = vadd.f32 1.0, %v1010_v37  ;;  %v729_v39 = vmul.f32 -0.5, %v1010_v37  ;;  %v732_v46 = vand.u32 2147483647, %v1010_v37  ;;  %v547_v3 = vld [vmem:[#allocation5 + $0x8] sm:$0xff] }
 0x4da   : > { %641 = vmatpush.xpose.msra.mxu0 %v625_v5  ;;  %v735_v28 = vadd.f32 1.0, %v1012_v24  ;;  %v738_v40 = vmul.f32 -0.5, %v1012_v24  ;;  %v741_v47 = vand.u32 2147483647, %v1012_v24  ;;  %v536_v5 = vld [vmem:[#allocation2] sm:$0xff] }
 0x4db   : > { %v604_v7 = vsub.f32 1.5, %v603_v6  ;;  %1013 = vlog2.f32 %v726_v38  ;;  %v730_v41 = vadd.f32 1.0, %v729_v39  ;;  %vm733_vm13 = vcmp.lt.f32.partialorder %v732_v46, 0.0004427343  ;;  %v552_v6 = vld [vmem:[#allocation4] sm:$0xff] }
 0x4dc   : > { %1015 = vlog2.f32 %v735_v28  ;;  %v739_v42 = vadd.f32 1.0, %v738_v40  ;;  %vm742_vm14 = vcmp.lt.f32.partialorder %v741_v47, 0.0004427343  ;;  %v549_v14 = vmul.f32 0.9, %v547_v3 }
 0x4dd   : > { %v605_v8 = vmul.f32 %v1008_v0, %v604_v7  ;;  %v731_v51 = vmul.f32 %v1010_v37, %v730_v41  ;;  %v554_v19 = vmul.f32 0.0005, %v552_v6 }
 0x4df   : > { %v609_v9 = vsel %vm608_vm10, %v1008_v0, %v605_v8  ;;  %v538_v0 = vld [vmem:[#allocation3] sm:$0xff]  ;;  %v537_v8 = vld [vmem:[#allocation2 + $0x8] sm:$0xff]  ;;  %vm771_vm10 = vcmp.eq.s32.totalorder %v1276_v18, 2 }
 0x4e0   : > { %v610_v10 = vmul.f32 %v609_v9, %v594_v52  ;;  %v740_v52 = vmul.f32 %v1012_v24, %v739_v42  ;;  %1017 = vlog2.f32 %v538_v0 }
 0x4e1   : > { %v1014_v43 = vpop.eup %1013  ;;  %1019 = vlog2.f32 %v539_v1 }
 0x4e2   : > { %642 = vmatmul.f32.vlgmr.msra.gmra.mxu0 %v610_v10  ;;  %v1016_v48 = vpop.eup %1015  ;;  %v728_v50 = vmul.f32 0.6931472, %v1014_v43  ;;  %v548_v10 = vmul.f32 0.9, %v546_v2 }
 0x4e3   : > { %v737_v54 = vmul.f32 0.6931472, %v1016_v48 }
 0x4e4   : > { %v734_v55 = vsel %vm733_vm13, %v731_v51, %v728_v50  ;;  %v1134_v51 = vmov 6.0  }
 0x4e5   : > { %v743_v56 = vsel %vm742_vm14, %v740_v52, %v737_v54  ;;  %v744_v57 = vadd.f32 %v734_v55, %v716_v44 }
 0x4e6   : > { %v745_v58 = vadd.f32 %v743_v56, %v717_v49  ;;  %v1018_v4 = vpop.eup %1017 }
 0x4e7   : > { %v748_v59 = vsel %vm1356_vm2, %v744_v57, 0.0  ;;  %v1020_v7 = vpop.eup %1019  ;;  %v541_v9 = vmul.f32 0.6931472, %v1018_v4 }
 0x4e8   : > { %v749_v60 = vsel %vm747_vm5, %v745_v58, 0.0  ;;  %v750_v61 = vsel %vm676_vm4, %v748_v59, 0.0  ;;  %v543_v13 = vmul.f32 0.6931472, %v1020_v7 }
 0x4e9   : > { %v751_v62 = vsel %vm676_vm4, %v749_v60, 0.0  ;;  %v544_v16 = vadd.f32 %v541_v9, %v536_v5 }
 0x4ea   : > { %v752_v63 = vadd.f32 %v751_v62, %v750_v61  ;;  %v545_v20 = vadd.f32 %v543_v13, %v537_v8 }
 0x4eb   : > { %v550_v22 = vsub.f32 %v544_v16, %v548_v10 }
 0x4ec   : > { %753 = vadd.xlane.f32.xlu1 %v752_v63  ;;  %v551_v23 = vsub.f32 %v545_v20, %v549_v14 }
 0x4ed   : > { %v556_v25 = vsub.f32 %v550_v22, %v554_v19 }
 0x4ee   : > { %v557_v26 = vsub.f32 %v551_v23, %v555_v21 }
 0x4ef   : > { %v571_v27 = vsel %vm561_vm15, %v556_v25, 0.0 }
 0x4f0   : > { %v572_v29 = vsel %vm566_vm0, %v557_v26, 0.0  ;;  %v573_v30 = vsel %vm409_vm3, %v571_v27, 0.0 }
 0x4f1   : > { %v574_v31 = vsel %vm409_vm3, %v572_v29, 0.0 }
 0x4f2   : > { %v575_v32 = vadd.f32 %v574_v31, %v573_v30 }
 0x4f4   : > { %576 = vadd.xlane.f32.xlu2 %v575_v32 }
 0x55f   : > { %v643_v33 = vpop.f32.mrf.mxu0  ;;  %v754_v0 = vpop.xlane.xlu1 %753 }
 0x560   : > { %v891_v34 = vadd.f32 -0.6, %v643_v33  ;;  %v892_v35 = vadd.f32 -0.4, %v643_v33  ;;  %v755_v1 = vrot.slane %v754_v0, 4 }
 0x562   : > { %v654_v36 = vmul.f32 -10.0, %v891_v34  ;;  %v656_v37 = vmul.f32 40.0, %v892_v35  ;;  %v756_v2 = vadd.f32 %v755_v1, %v754_v0 }
 0x564   : > { %v657_v24 = vsel %vm652_vm6, %v654_v36, %v656_v37  ;;  %v757_v3 = vrot.slane %v756_v2, 2 }
 0x565   : > { %v659_v38 = vand.u32 2147483647, %v657_v24  ;;  %v658_v48 = vmax.f32 %v657_v24, 0.0 }
 0x566   : > { %v758_v7 = vadd.f32 %v757_v3, %v756_v2 }
 0x567   : > { %v660_v28 = vsub.f32 0.0, %v659_v38  ;;  %v577_v52 = vpop.xlane.xlu2 %576 }
 0x568   : > { %v578_v53 = vrot.slane %v577_v52, 4  ;;  %v759_v10 = vrot.slane %v758_v7, 1 }
 0x569   : > { %v661_v39 = vmul.f32 1.442695, %v660_v28 }
 0x56a   : > { %v579_v55 = vadd.f32 %v578_v53, %v577_v52  ;;  %v760_v14 = vadd.f32 %v759_v10, %v758_v7 }
 0x56b   : > { %1021 = vpow2.f32 %v661_v39 }
 0x56c   : > { %v580_v57 = vrot.slane %v579_v55, 2 }
 0x56e   : > { %v581_v59 = vadd.f32 %v580_v57, %v579_v55 }
 0x570   : > { %v582_v61 = vrot.slane %v581_v59, 1 }
 0x571   : > { %v1022_v40 = vpop.eup %1021 }
 0x572   : > { %v663_v41 = vadd.f32 1.0, %v1022_v40  ;;  %v666_v42 = vmul.f32 -0.5, %v1022_v40  ;;  %v669_v44 = vand.u32 2147483647, %v1022_v40  ;;  %v583_v63 = vadd.f32 %v582_v61, %v581_v59 }
 0x574   : > { %1023 = vlog2.f32 %v663_v41  ;;  %v667_v43 = vadd.f32 1.0, %v666_v42  ;;  %vm670_vm3 = vcmp.lt.f32.partialorder %v669_v44, 0.0004427343  ;;  %915 = vpush %v583_v63 }
 0x575   : > { %1025 = vrcp.f32 %v1134_v51 }
 0x576   : > { %v668_v47 = vmul.f32 %v1022_v40, %v667_v43 }
 0x57a   : > { %v1024_v45 = vpop.eup %1023 }
 0x57b   : > { %v665_v46 = vmul.f32 0.6931472, %v1024_v45  ;;  %v1026_v54 = vpop.eup %1025 }
 0x57c   : > { %v586_v56 = vmul.f32 6.0, %v1026_v54  ;;  %vm590_vm7 = vweird.f32 %v1026_v54 }
 0x57d   : > { %v671_v49 = vsel %vm670_vm3, %v668_v47, %v665_v46 }
 0x57e   : > { %v672_v50 = vadd.f32 %v671_v49, %v658_v48  ;;  %v587_v58 = vsub.f32 1.0, %v586_v56 }
 0x580   : > { %v675_v11 = vsel %vm1356_vm2, %v672_v50, 0.0  ;;  %v588_v60 = vmul.f32 %v1026_v54, %v587_v58 }
 0x581   : > { %v677_v15 = vsel %vm676_vm4, %v675_v11, 0.0 }
 0x582   : > { %678 = vadd.xlane.f32.xlu0 %v677_v15  ;;  %v589_v62 = vadd.f32 %v1026_v54, %v588_v60 }
 0x584   : > { %v591_v17 = vsel %vm590_vm7, %v1026_v54, %v589_v62 }
 0x585   : > { %917 = vpush %v591_v17 }
 0x5a5   : > { %s916_s9 = spop %915 }
 0x5b6   : > { %s918_s30 = spop %917 }
 0x5b7   : > { %s593_s8 = smul.f32 %s918_s30, %s916_s9 }
 0x5b9   : > { %v692_v19 = vstv %s593_s8 }
 0x5f5   : > { %v679_v4 = vpop.xlane.xlu0 %678 }
 0x5f6   : > { %v680_v5 = vrot.slane %v679_v4, 4 }
 0x5f8   : > { %v681_v6 = vadd.f32 %v680_v5, %v679_v4 }
 0x5fa   : > { %v682_v8 = vrot.slane %v681_v6, 2 }
 0x5fc   : > { %v683_v9 = vadd.f32 %v682_v8, %v681_v6 }
 0x5fe   : > { %v684_v12 = vrot.slane %v683_v9, 1 }
 0x600   : > { %v685_v13 = vadd.f32 %v684_v12, %v683_v9 }
 0x602   : > { %919 = vpush %v685_v13 }
 0x603   : > { %921 = vpush %v760_v14 }
 0x633   : > { %s920_s10 = spop %919 }
 0x634   : > { %s687_s11 = smul.f32 0.5, %s920_s10  ;;  %s922_s12 = spop %921 }
 0x635   : > { %s770_s13 = smul.f32 %s922_s12, %s918_s30 }
 0x636   : > { %v690_v16 = vstv %s687_s11 }
 0x637   : > { %v691_v20 = vsel %vm689_vm8, %v690_v16, 0.0  ;;  %v772_v22 = vstv %s770_s13 }
 0x638   : > { %v693_v21 = vsel %vm688_vm9, %v692_v19, %v691_v20 }
 0x639   : > { %v773_v23 = vsel %vm771_vm10, %v772_v22, %v693_v21 }
 0x63a   : > { %774 = vst [vmem:[#allocation10] sm:$0x1] %v773_v23 }
 0x63b PF: > { %s783_s15 = sshll.u32 %s1405_s6, 4  ;;  %s1135_s24 = smov [#allocation10]   ;;  %s784_s15 = int_to_ptr.hbm [resolvable:$true] %s783_s15 }
 0x63c   : > { %s781_s16 = sshll.u32 %s1135_s24, 4  ;;  %s782_s16 = int_to_ptr.vmem [resolvable:$true] %s781_s16 }
 0x63d   : > { %926 = dma.vmem_to_hbm [thread:$0]  (%p889_p9), %s782_s16, 16, %s784_s15, [#allocation9]  }
 0x63e   : > { %1106 = dma.done.wait (%p889_p9), [#allocation9], 16  }
 0x63f   : > { %1108 = vsyncadd (%p889_p9), [#allocation9], 4294967280 }
 0x640 PF: > { %p17_p10 = scmp.ge.s32.totalorder %s1193_s26, 4   ;;  %s1411_s21 = smov %s1115_s22 }
 0x641   : > { %s1412_s22 = smov %s1119_s23  ;;  %s1413_s23 = smov %s1203_s29 }
 0x642   : > { %s1414_s24 = smov %s1193_s26  ;;  %19 = sbr.rel (!%p17_p10) target bundleno = 4 (0x4), region = 100 }
 0x647   :  { %797 = vsyncpa [#allocation8], 1 }
 0x648   :  { %799 = vsyncpa [#allocation8 + $0x1], 1 }
 0x649   :  { %800 = vsyncpa [#allocation9], 1 }
 0x64a   :  { %802 = vsyncpa [#allocation9 + $0x1], 1 }

</bundles_post_ra>
